<compile_context>
chip_gen: v7x
topology: tpu7x:2x2x1
jax: 0.10.0
libtpu: 0.0.40
codegen_flags: <defaults>
</compile_context>

<pallas_src>
import numpy as np
import jax
import jax.numpy as jnp
from jax import lax
from jax.experimental import pallas as pl
from jax.experimental.pallas import tpu as pltpu


def _highway_kernel(x_ref, w_ref, b_ref, o_ref):
    """x_ref: (tn, H) row tile (input dtype).
    w_ref: (L, H, 2H) fused [transform | gate] weights (bf16 or f32), resident.
    b_ref: (L, 1, 2H) fused biases (f32), resident.
    o_ref: (tn, H) output tile (input dtype)."""
    H = x_ref.shape[-1]
    num_layers = w_ref.shape[0]

    x = x_ref[...].astype(jnp.float32)                # elementwise math in f32

    def layer(l, x):
        xb = x.astype(w_ref.dtype)                    # bf16 operands -> native MXU rate
        y = jnp.dot(xb, w_ref[l],
                    preferred_element_type=jnp.float32) + b_ref[l]   # (tn, 2H) f32
        t = jnp.maximum(y[:, :H], 0.0)                # relu     (VPU, f32)
        g = jax.nn.sigmoid(y[:, H:])                  # sigmoid  (EUP, f32)
        return x + g * (t - x)                        # highway blend, FMA-friendly

    if num_layers <= 4:
        for l in range(num_layers):                   # static unroll for small L
            x = layer(l, x)
    else:
        x = lax.fori_loop(0, num_layers, layer, x)    # bounds vreg live ranges

    o_ref[...] = x.astype(o_ref.dtype)


def pack_params(params, matmul_dtype=jnp.bfloat16):
    """Fuse per-layer transform/gate Linear params into the kernel layout.

    params: wt/wg (L, H, H) stored (in, out) so the kernel does x @ W; bt/bg (L, 1, H).
    Returns w_fused (L, H, 2H) in matmul_dtype and b_fused (L, 1, 2H) in f32,
    with the transform half in columns [:H] and the gate half in columns [H:].
    """
    wt, bt, wg, bg = params["wt"], params["bt"], params["wg"], params["bg"]
    w_fused = jnp.concatenate([wt, wg], axis=-1).astype(matmul_dtype)
    b_fused = jnp.concatenate([bt, bg], axis=-1).astype(jnp.float32)
    return w_fused, b_fused


def highway_encoder_pallas(x, params, *, tile_n=512, matmul_dtype=jnp.bfloat16):
    """x: (..., H).  Returns the same shape and dtype as x."""
    w_fused, b_fused = pack_params(params, matmul_dtype)
    num_layers, H, H2 = w_fused.shape

    orig_shape = x.shape
    x2 = x.reshape(-1, H)                 # keep native dtype (bf16 stays bf16)
    N = x2.shape[0]

    # Row tile: full N if it fits in one tile, else a multiple of 8 rows; the
    # ragged last block is masked by Pallas (no host-side padding pass).
    if N <= tile_n:
        tn = N
    else:
        tn = max(8, (tile_n // 8) * 8)
    grid = (pl.cdiv(N, tn),)

    # Explicit VMEM budget: resident fused weights/biases (+ pipeline buffer)
    # plus double-buffered x and out tiles, with headroom.
    x_bytes = x2.dtype.itemsize
    resident = (w_fused.size * w_fused.dtype.itemsize
                + b_fused.size * b_fused.dtype.itemsize)
    streamed = 2 * (2 * tn * H * x_bytes)            # in + out, double-buffered
    vmem_limit = int(min(max(2 * (resident + streamed) + (4 << 20), 16 << 20),
                         128 << 20))

    const3 = lambda i: (0, 0, 0)   # weights/biases: same block every step (resident)

    out = pl.pallas_call(
        _highway_kernel,
        out_shape=jax.ShapeDtypeStruct((N, H), x2.dtype),
        grid_spec=pltpu.PrefetchScalarGridSpec(
            num_scalar_prefetch=0,
            grid=grid,
            in_specs=[
                pl.BlockSpec((tn, H), lambda i: (i, 0)),          # x row tile (pipelined)
                pl.BlockSpec((num_layers, H, H2), const3),        # fused weights (resident)
                pl.BlockSpec((num_layers, 1, H2), const3),        # fused biases  (resident)
            ],
            out_specs=pl.BlockSpec((tn, H), lambda i: (i, 0)),
        ),
        compiler_params=pltpu.CompilerParams(
            dimension_semantics=("parallel",),       # shard row tiles across TCs
            vmem_limit_bytes=vmem_limit,
        ),
    )(x2, w_fused, b_fused)

    return out.reshape(orig_shape)


def init_params(key, num_layers, H):
    """Mirror nn.Linear(H, H) init: U(-1/sqrt(H), 1/sqrt(H)) for weight & bias.
    Weights stored pre-transposed as (in, out) so the forward does x @ W."""
    ks = jax.random.split(key, 4 * num_layers)

    def u(k, shape):
        s = 1.0 / np.sqrt(H)
        return jax.random.uniform(k, shape, jnp.float32, -s, s)

    wt = jnp.stack([u(ks[4 * l + 0], (H, H)) for l in range(num_layers)])
    bt = jnp.stack([u(ks[4 * l + 1], (1, H)) for l in range(num_layers)])
    wg = jnp.stack([u(ks[4 * l + 2], (H, H)) for l in range(num_layers)])
    bg = jnp.stack([u(ks[4 * l + 3], (1, H)) for l in range(num_layers)])
    return {"wt": wt, "bt": bt, "wg": wg, "bg": bg}


def ref_forward(x, params):
    """Pure-JAX f32 reference with identical semantics to the PyTorch module."""
    wt, bt, wg, bg = params["wt"], params["bt"], params["wg"], params["bg"]
    num_layers = wt.shape[0]
    for l in range(num_layers):
        t = jnp.maximum(x @ wt[l] + bt[l][0], 0.0)
        g = jax.nn.sigmoid(x @ wg[l] + bg[l][0])
        x = g * t + (1.0 - g) * x
    return x


if __name__ == "__main__":
    key = jax.random.PRNGKey(0)
    k_x, k_p, k_x2 = jax.random.split(key, 3)

    # Primary case: batch=2, seq=8, hidden=32, 2 highway layers.
    num_layers, H = 2, 32
    B, L = 2, 8
    x = jax.random.normal(k_x, (B, L, H), jnp.float32)
    params = init_params(k_p, num_layers, H)
    ref = ref_forward(x, params)

    # bf16-MXU path (default): f32 accumulation, f32 elementwise -> loose tol.
    out = jax.block_until_ready(highway_encoder_pallas(x, params))
    assert out.shape == (B, L, H) and out.dtype == x.dtype
    np.testing.assert_allclose(np.asarray(out), np.asarray(ref), rtol=5e-2, atol=5e-2)

    # Exact-f32 operand path: must match the reference tightly.
    out_f32 = jax.block_until_ready(
        highway_encoder_pallas(x, params, matmul_dtype=jnp.float32))
    np.testing.assert_allclose(np.asarray(out_f32), np.asarray(ref), rtol=2e-5, atol=2e-5)

    # Multi-tile + ragged last block path (N=150 rows, tile of 64 rows).
    x_big = jax.random.normal(k_x2, (3, 50, H), jnp.float32)
    ref_big = ref_forward(x_big, params)
    out_big = jax.block_until_ready(
        highway_encoder_pallas(x_big, params, tile_n=64))
    assert out_big.shape == x_big.shape and out_big.dtype == x_big.dtype
    np.testing.assert_allclose(np.asarray(out_big), np.asarray(ref_big),
                               rtol=5e-2, atol=5e-2)

    print("KERNEL_OK")
</pallas_src>

<mosaic_0001>
module attributes {stable_mosaic.version = 11 : i64} {
  func.func @_highway_kernel(%arg0: i32, %arg1: memref<16x32xf32, #tpu.memory_space<vmem>>, %arg2: memref<2x32x64xbf16, #tpu.memory_space<vmem>>, %arg3: memref<2x1x64xf32, #tpu.memory_space<vmem>>, %arg4: memref<16x32xf32, #tpu.memory_space<vmem>>) attributes {dimension_semantics = [#tpu.dimension_semantics<parallel>], iteration_bounds = array<i64: 1>, scalar_prefetch = 0 : i64, scratch_operands = 0 : i64, tpu.core_type = #tpu.core_type<tc>, window_params = [{transform_indices = @transform_0, window_bounds = array<i64: 16, 32>}, {pipeline_mode = #tpu.pipeline_mode<synchronous>, transform_indices = @transform_1, window_bounds = array<i64: 2, 32, 64>}, {pipeline_mode = #tpu.pipeline_mode<synchronous>, transform_indices = @transform_2, window_bounds = array<i64: 2, 1, 64>}, {transform_indices = @transform_3, window_bounds = array<i64: 16, 32>}]} {
    %c0 = arith.constant 0 : index
    %c0_0 = arith.constant 0 : index
    %0 = vector.load %arg1[%c0, %c0_0] : memref<16x32xf32, #tpu.memory_space<vmem>>, vector<16x32xf32>
    %1 = arith.truncf %0 : vector<16x32xf32> to vector<16x32xbf16>
    %c0_1 = arith.constant 0 : index
    %c0_2 = arith.constant 0 : index
    %c0_3 = arith.constant 0 : index
    %2 = vector.load %arg2[%c0_1, %c0_2, %c0_3] : memref<2x32x64xbf16, #tpu.memory_space<vmem>>, vector<1x32x64xbf16>
    %3 = vector.shape_cast %2 : vector<1x32x64xbf16> to vector<32x64xbf16>
    %cst = arith.constant dense<0.000000e+00> : vector<16x64xf32>
    %4 = tpu.matmul %1, %3, %cst {dimension_numbers = #tpu.dot_dimension_numbers<[1], [0], [0], [1], [0, 0, 1, 1], [], []>} : vector<16x32xbf16>, vector<32x64xbf16>, vector<16x64xf32> -> vector<16x64xf32>
    %c0_4 = arith.constant 0 : index
    %c0_5 = arith.constant 0 : index
    %c0_6 = arith.constant 0 : index
    %5 = vector.load %arg3[%c0_4, %c0_5, %c0_6] : memref<2x1x64xf32, #tpu.memory_space<vmem>>, vector<1x1x64xf32>
    %6 = vector.shape_cast %5 : vector<1x1x64xf32> to vector<1x64xf32>
    %7 = vector.broadcast %6 : vector<1x64xf32> to vector<16x64xf32>
    %8 = arith.addf %4, %7 : vector<16x64xf32>
    %9 = vector.extract_strided_slice %8 {offsets = [0, 0], sizes = [16, 32], strides = [1, 1]} : vector<16x64xf32> to vector<16x32xf32>
    %cst_7 = arith.constant 0.000000e+00 : f32
    %10 = vector.broadcast %cst_7 : f32 to vector<16x32xf32>
    %11 = arith.maximumf %9, %10 : vector<16x32xf32>
    %12 = vector.extract_strided_slice %8 {offsets = [0, 32], sizes = [16, 32], strides = [1, 1]} : vector<16x64xf32> to vector<16x32xf32>
    %13 = arith.negf %12 : vector<16x32xf32>
    %14 = math.exp %13 : vector<16x32xf32>
    %cst_8 = arith.constant 1.000000e+00 : f32
    %15 = vector.broadcast %cst_8 : f32 to vector<16x32xf32>
    %16 = arith.addf %15, %14 : vector<16x32xf32>
    %17 = arith.divf %15, %16 : vector<16x32xf32>
    %18 = arith.subf %11, %0 : vector<16x32xf32>
    %19 = arith.mulf %17, %18 : vector<16x32xf32>
    %20 = arith.addf %0, %19 : vector<16x32xf32>
    %21 = arith.truncf %20 : vector<16x32xf32> to vector<16x32xbf16>
    %c1 = arith.constant 1 : index
    %c0_9 = arith.constant 0 : index
    %c0_10 = arith.constant 0 : index
    %22 = vector.load %arg2[%c1, %c0_9, %c0_10] : memref<2x32x64xbf16, #tpu.memory_space<vmem>>, vector<1x32x64xbf16>
    %23 = vector.shape_cast %22 : vector<1x32x64xbf16> to vector<32x64xbf16>
    %cst_11 = arith.constant dense<0.000000e+00> : vector<16x64xf32>
    %24 = tpu.matmul %21, %23, %cst_11 {dimension_numbers = #tpu.dot_dimension_numbers<[1], [0], [0], [1], [0, 0, 1, 1], [], []>} : vector<16x32xbf16>, vector<32x64xbf16>, vector<16x64xf32> -> vector<16x64xf32>
    %c1_12 = arith.constant 1 : index
    %c0_13 = arith.constant 0 : index
    %c0_14 = arith.constant 0 : index
    %25 = vector.load %arg3[%c1_12, %c0_13, %c0_14] : memref<2x1x64xf32, #tpu.memory_space<vmem>>, vector<1x1x64xf32>
    %26 = vector.shape_cast %25 : vector<1x1x64xf32> to vector<1x64xf32>
    %27 = vector.broadcast %26 : vector<1x64xf32> to vector<16x64xf32>
    %28 = arith.addf %24, %27 : vector<16x64xf32>
    %29 = vector.extract_strided_slice %28 {offsets = [0, 0], sizes = [16, 32], strides = [1, 1]} : vector<16x64xf32> to vector<16x32xf32>
    %cst_15 = arith.constant 0.000000e+00 : f32
    %30 = vector.broadcast %cst_15 : f32 to vector<16x32xf32>
    %31 = arith.maximumf %29, %30 : vector<16x32xf32>
    %32 = vector.extract_strided_slice %28 {offsets = [0, 32], sizes = [16, 32], strides = [1, 1]} : vector<16x64xf32> to vector<16x32xf32>
    %33 = arith.negf %32 : vector<16x32xf32>
    %34 = math.exp %33 : vector<16x32xf32>
    %cst_16 = arith.constant 1.000000e+00 : f32
    %35 = vector.broadcast %cst_16 : f32 to vector<16x32xf32>
    %36 = arith.addf %35, %34 : vector<16x32xf32>
    %37 = arith.divf %35, %36 : vector<16x32xf32>
    %38 = arith.subf %31, %20 : vector<16x32xf32>
    %39 = arith.mulf %37, %38 : vector<16x32xf32>
    %40 = arith.addf %20, %39 : vector<16x32xf32>
    %c0_17 = arith.constant 0 : index
    %c0_18 = arith.constant 0 : index
    %41 = vector.load %arg4[%c0_17, %c0_18] : memref<16x32xf32, #tpu.memory_space<vmem>>, vector<16x32xf32>
    tpu.vector_store %arg4[%c0_17, %c0_18], %40 {strides = array<i32>} : memref<16x32xf32, #tpu.memory_space<vmem>>, vector<16x32xf32>,
    return
  }
  func.func @transform_0(%arg0: i32) -> (i32, i32) {
    %c0_i32 = arith.constant 0 : i32
    %c0_i32_0 = arith.constant 0 : i32
    return %arg0, %c0_i32 : i32, i32
  }
  func.func @transform_1(%arg0: i32) -> (i32, i32, i32) {
    %c0_i32 = arith.constant 0 : i32
    %c0_i32_0 = arith.constant 0 : i32
    %c0_i32_1 = arith.constant 0 : i32
    %c0_i32_2 = arith.constant 0 : i32
    return %c0_i32, %c0_i32_0, %c0_i32_1 : i32, i32, i32
  }
  func.func @transform_2(%arg0: i32) -> (i32, i32, i32) {
    %c0_i32 = arith.constant 0 : i32
    %c0_i32_0 = arith.constant 0 : i32
    %c0_i32_1 = arith.constant 0 : i32
    %c0_i32_2 = arith.constant 0 : i32
    return %c0_i32, %c0_i32_0, %c0_i32_1 : i32, i32, i32
  }
  func.func @transform_3(%arg0: i32) -> (i32, i32) {
    %c0_i32 = arith.constant 0 : i32
    %c0_i32_0 = arith.constant 0 : i32
    return %arg0, %c0_i32 : i32, i32
  }
}

</mosaic_0001>

<bundles_post_ra>
// kernel: tpu_custom_call.1
= control target key start
LH: loop header
LB: loop body
LE: loop exit
PB: predicated region body
PF: predicated region fallthrough
CT: control target
= control target key end

     0   :  { %8 = vsyncpa [#allocation3], 0  ;;  %s506_s0 = inlined_call_operand.hbm [shape: f32[16,32], index: 0, kind: input, shape index: {}]   ;;  %s507_s1 = inlined_call_operand.hbm [shape: bf16[2,32,64], index: 1, kind: input, shape index: {}]   ;;  %s508_s2 = inlined_call_operand.vmem [shape: f32[2,1,64], index: 2, kind: input, shape index: {}]   ;;  %s509_s3 = inlined_call_operand.hbm [shape: f32[16,32], index: 3, kind: output, shape index: {}]  }
   0x1   :  { %9 = vsyncpa [#allocation6], 0 }
   0x2   :  { %10 = vsyncpa [#allocation4], 0  ;;  %s415_s12 = smov [#allocation2]   ;;  %s343_s16 = scalar_lea.hbm %s506_s0, 256 }
   0x3   :  { %s16_s13 = sshll.u32 %s415_s12, 4  ;;  %p344_p0 = scmp.ne.s32.totalorder %s506_s0, %s343_s16  ;;  %s17_s13 = int_to_ptr.vmem [resolvable:$true] %s16_s13 }
   0x4   :  { %p347_p1 = scmp.lt.u32.totalorder %s343_s16, %s506_s0 }
   0x6   :  { %p349_p2 = pnand %p347_p1, %p344_p0 }
   0x8   :  { %352 = shalt.err (!%p349_p2)
}
   0x9   :  { %s353_s21 = scalar_lea.vmem %s17_s13, 256  ;;  %p358_p4 = scmp.lt.s32.totalorder %s17_s13, %s17_s13 }
   0xa   :  { %p354_p3 = scmp.ne.s32.totalorder %s17_s13, %s353_s21  ;;  %p359_p5 = scmp.lt.s32.totalorder %s353_s21, %s353_s21 }
   0xc   :  { %p360_p6 = por %p359_p5, %p358_p4 }
   0xe   :  { %p361_p7 = pnand %p360_p6, %p354_p3 }
  0x10   :  { %364 = shalt.err (!%p361_p7)
}
  0x11   :  { %s416_s22 = smov 128   ;;  %s417_s23 = smov 8  }
  0x12   :  { %22 = dma.hbm_to_vmem [thread:$0]  %s506_s0, 256, %s17_s13, [#allocation3], %s416_s22, %s416_s22, %s417_s23  }
  0x13   :  { %s418_s26 = smov [#allocation5]   ;;  %s365_s30 = scalar_lea.hbm %s507_s1, 512 }
  0x14   :  { %s28_s27 = sshll.u32 %s418_s26, 4  ;;  %p366_p8 = scmp.ne.s32.totalorder %s507_s1, %s365_s30  ;;  %s29_s27 = int_to_ptr.vmem [resolvable:$true] %s28_s27 }
  0x15   :  { %p369_p9 = scmp.lt.u32.totalorder %s365_s30, %s507_s1 }
  0x17   :  { %p371_p10 = pnand %p369_p9, %p366_p8 }
  0x19   :  { %374 = shalt.err (!%p371_p10)
}
  0x1a   :  { %s375_s8 = scalar_lea.vmem %s29_s27, 512  ;;  %p380_p12 = scmp.lt.s32.totalorder %s29_s27, %s29_s27 }
  0x1b   :  { %p376_p11 = scmp.ne.s32.totalorder %s29_s27, %s375_s8  ;;  %p381_p13 = scmp.lt.s32.totalorder %s375_s8, %s375_s8 }
  0x1d   :  { %p382_p0 = por %p381_p13, %p380_p12 }
  0x1f   :  { %p383_p1 = pnand %p382_p0, %p376_p11 }
  0x21   :  { %386 = shalt.err (!%p383_p1)
}
  0x22   :  { %s419_s0 = smov 64   ;;  %s420_s9 = smov 4  }
  0x23   :  { %34 = dma.hbm_to_vmem [thread:$0]  %s507_s1, 512, %s29_s27, [#allocation6], %s419_s0, %s419_s0, %s420_s9  }
  0x24   :  { %409 = dma.done.wait [#allocation3], 256  }
  0x25   :  { %410 = vsyncadd [#allocation3], 4294967040 }
  0x26   :  { %411 = dma.done.wait [#allocation6], 512  }
  0x27   :  { %412 = vsyncadd [#allocation6], 4294966784  ;;  %v421_v0 = vmov 0.0   ;;  %vm422_vm0 = vmmov 0   ;;  %v323_v1 = vld [vmem:[#allocation5] sm:$0xff]   ;;  %v324_v2 = vld [vmem:[#allocation5 + $0x8] sm:$0xff]  }
  0x28   :  { %296 = vmatprep.subr.bf16.mxu0 %v421_v0  ;;  %300 = vmatprep.mubr.msk.bf16.mxu0 %vm422_vm0, %v421_v0  ;;  %v44_v3 = vld [vmem:[#allocation2] sm:$0xff]  ;;  %v45_v4 = vld [vmem:[#allocation2 + $0x8] sm:$0xff]  ;;  %vm70_vm1 = vcmask 261120   ;;  %s423_s13 = smov 32   ;;  %s424_s14 = smov 96  }
  0x29   :  { %304 = vmatprep.subr.bf16.mxu1 %v421_v0  ;;  %308 = vmatprep.mubr.msk.bf16.mxu1 %vm422_vm0, %v421_v0  ;;  %v46_v5 = vpack.c.bf16 %v45_v4, %v44_v3  ;;  %v277_v6 = vld [vmem:[%s508_s2] ss:$0 sm:$0xff]  ;;  %v326_v24 = vld [vmem:[#allocation5 + $0x18] sm:$0xff]   ;;  %v284_v36 = vld [vmem:[%s508_s2 + $0x1] ss:$0 sm:$0xff]  ;;  %s425_s2 = smov [#allocation7]  }
  0x2a   :  { %297 = vmatpush3.bf16.msra.mxu0 %v323_v1  ;;  %v325_v22 = vld [vmem:[#allocation5 + $0x10] sm:$0xff]   ;;  %s264_s17 = sshll.u32 %s425_s2, 4  ;;  %s265_s17 = int_to_ptr.vmem [resolvable:$true] %s264_s17 }
  0x2b   :  { %298 = vmatprep.subr.bf16.mxu0 %v421_v0  ;;  %305 = vmatpush3.bf16.msra.mxu1 %v325_v22  ;;  %s387_s18 = scalar_lea.vmem %s265_s17, 256  ;;  %p392_p3 = scmp.lt.s32.totalorder %s265_s17, %s265_s17 }
  0x2c   :  { %306 = vmatprep.subr.bf16.mxu1 %v421_v0  ;;  %p388_p2 = scmp.ne.s32.totalorder %s265_s17, %s387_s18  ;;  %p393_p4 = scmp.lt.s32.totalorder %s387_s18, %s387_s18 }
  0x2e   :  { %299 = vmatpush3.bf16.msra.mxu0 %v324_v2  ;;  %p394_p5 = por %p393_p4, %p392_p3 }
  0x2f   :  { %307 = vmatpush3.bf16.msra.mxu1 %v326_v24 }
  0x30   :  { %p395_p6 = pnand %p394_p5, %p388_p2 }
  0x31   :  { %301 = vmatmul.mubr.msk.bf16.vlgmr.msra.gmra.mrb[0].mxu0 %vm70_vm1, %v46_v5 }
 0x104   :  { %v108_v7 = vpop.f32.mrb[0].mxu0 }
 0x105   :  { %v109_v8 = vadd.f32 %v277_v6, %v108_v7  ;;  %v302_v9 = vpop.f32.mrb[1].mxu0 }
 0x106   :  { %v111_v10 = vpop.f32.mrb[2].mxu0 }
 0x107   :  { %v115_v11 = vmax.f32 %v109_v8, 0.0  ;;  %v112_v12 = vadd.f32 %v277_v6, %v111_v10  ;;  %v303_v13 = vpop.f32.mrb[3].mxu0  ;;  %v281_v17 = vmul.f32 -1.442695, %v109_v8 }
 0x109   :  { %v116_v14 = vmax.f32 %v112_v12, 0.0  ;;  %v129_v15 = vsub.f32 %v115_v11, %v44_v3  ;;  %327 = vpow2.f32 %v281_v17  ;;  %v282_v18 = vmul.f32 -1.442695, %v112_v12 }
 0x10b   :  { %133 = vrot.lane.b32.xlu0 %v129_v15, %s423_s13  ;;  %v130_v16 = vsub.f32 %v116_v14, %v45_v4  ;;  %329 = vpow2.f32 %v282_v18 }
 0x10f   :  { %135 = vrot.lane.b32.xlu0 %v130_v16, %s423_s13 }
 0x113   :  { %v328_v19 = vpop.eup %327 }
 0x114   :  { %v123_v20 = vadd.f32 1.0, %v328_v19 }
 0x115   :  { %v330_v21 = vpop.eup %329 }
 0x116   :  { %331 = vrcp.f32 %v123_v20  ;;  %v124_v23 = vadd.f32 1.0, %v330_v21 }
 0x118   :  { %333 = vrcp.f32 %v124_v23 }
 0x120   :  { %v332_v25 = vpop.eup %331 }
 0x122   :  { %v334_v28 = vpop.eup %333 }
 0x17d   :  { %v134_v26 = vpop.permute.xlu0 %133 }
 0x17e   :  { %v139_v27 = vmul.f32 %v332_v25, %v134_v26 }
 0x180   :  { %143 = vrot.lane.b32.xlu1 %v139_v27, %s424_s14 }
 0x181   :  { %v136_v29 = vpop.permute.xlu0 %135 }
 0x182   :  { %v140_v30 = vmul.f32 %v334_v28, %v136_v29 }
 0x184   :  { %145 = vrot.lane.b32.xlu1 %v140_v30, %s424_s14 }
 0x1f2   :  { %v144_v31 = vpop.permute.xlu1 %143 }
 0x1f3   :  { %v149_v33 = vadd.f32 %v144_v31, %v44_v3 }
 0x1f6   :  { %v146_v32 = vpop.permute.xlu1 %145 }
 0x1f7   :  { %v150_v34 = vadd.f32 %v146_v32, %v45_v4 }
 0x1f9   :  { %v151_v35 = vpack.c.bf16 %v150_v34, %v149_v33 }
 0x1fb   :  { %309 = vmatmul.mubr.msk.bf16.vlgmr.msra.gmra.mrb[0].mxu1 %vm70_vm1, %v151_v35 }
 0x2ce   :  { %v214_v37 = vpop.f32.mrb[0].mxu1 }
 0x2cf   :  { %v215_v38 = vadd.f32 %v284_v36, %v214_v37  ;;  %v310_v39 = vpop.f32.mrb[1].mxu1 }
 0x2d0   :  { %v217_v40 = vpop.f32.mrb[2].mxu1 }
 0x2d1   :  { %v221_v41 = vmax.f32 %v215_v38, 0.0  ;;  %v218_v42 = vadd.f32 %v284_v36, %v217_v40  ;;  %v311_v43 = vpop.f32.mrb[3].mxu1  ;;  %v288_v47 = vmul.f32 -1.442695, %v215_v38 }
 0x2d3   :  { %v222_v44 = vmax.f32 %v218_v42, 0.0  ;;  %v235_v45 = vsub.f32 %v221_v41, %v149_v33  ;;  %v289_v48 = vmul.f32 -1.442695, %v218_v42  ;;  %335 = vpow2.f32 %v288_v47 }
 0x2d5   :  { %239 = vrot.lane.b32.xlu0 %v235_v45, %s423_s13  ;;  %v236_v46 = vsub.f32 %v222_v44, %v150_v34  ;;  %337 = vpow2.f32 %v289_v48 }
 0x2d7   :  { %241 = vrot.lane.b32.xlu1 %v236_v46, %s423_s13 }
 0x2dd   :  { %v336_v49 = vpop.eup %335 }
 0x2de   :  { %v229_v51 = vadd.f32 1.0, %v336_v49 }
 0x2df   :  { %v338_v50 = vpop.eup %337 }
 0x2e0   :  { %v230_v52 = vadd.f32 1.0, %v338_v50  ;;  %339 = vrcp.f32 %v229_v51 }
 0x2e2   :  { %341 = vrcp.f32 %v230_v52 }
 0x2ea   :  { %v340_v53 = vpop.eup %339 }
 0x2ec   :  { %v342_v56 = vpop.eup %341 }
 0x347   :  { %v240_v54 = vpop.permute.xlu0 %239 }
 0x348   :  { %v245_v55 = vmul.f32 %v340_v53, %v240_v54 }
 0x349   :  { %v242_v57 = vpop.permute.xlu1 %241 }
 0x34a   :  { %v246_v58 = vmul.f32 %v342_v56, %v242_v57  ;;  %249 = vrot.lane.b32.xlu0 %v245_v55, %s424_s14 }
 0x34c   :  { %251 = vrot.lane.b32.xlu1 %v246_v58, %s424_s14 }
 0x3bc   :  { %v250_v59 = vpop.permute.xlu0 %249 }
 0x3bd   :  { %v255_v60 = vadd.f32 %v250_v59, %v149_v33 }
 0x3be   :  { %v252_v61 = vpop.permute.xlu1 %251 }
 0x3bf   :  { %257 = vst.msk [vmem:[#allocation7] sm:$0xff] %vm70_vm1, %v255_v60  ;;  %v256_v62 = vadd.f32 %v252_v61, %v150_v34 }
 0x3c1   :  { %258 = vst.msk [vmem:[#allocation7 + $0x8] sm:$0xff] %vm70_vm1, %v256_v62 }
 0x3c2   :  { %398 = shalt.err (!%p395_p6)
}
 0x3c3   :  { %s399_s21 = scalar_lea.hbm %s509_s3, 256 }
 0x3c4   :  { %p400_p7 = scmp.ne.s32.totalorder %s509_s3, %s399_s21  ;;  %p403_p8 = scmp.lt.u32.totalorder %s399_s21, %s509_s3 }
 0x3c6   :  { %p405_p9 = pnand %p403_p8, %p400_p7 }
 0x3c8   :  { %408 = shalt.err (!%p405_p9)
}
 0x3c9   :  { %270 = dma.vmem_to_hbm [thread:$0]  %s265_s17, 256, %s509_s3, [#allocation4], %s416_s22, %s416_s22, %s417_s23  }
 0x3ca   :  { %413 = dma.done.wait [#allocation4], 256  }
 0x3cb   :  { %414 = vsyncadd [#allocation4], 4294967040 }
 0x3cc   :  { %274 = vsyncpa [#allocation3], 1 }
 0x3cd   :  { %275 = vsyncpa [#allocation6], 1 }
 0x3ce   :  { %276 = vsyncpa [#allocation4], 1 }

</bundles_post_ra>
